<compile_context>
chip_gen: v7x
topology: tpu7x:2x2x1
jax: 0.10.0
libtpu: 0.0.40
codegen_flags: <defaults>
</compile_context>

<pallas_src>
import math

import jax
import jax.numpy as jnp
from jax.experimental import pallas as pl
from jax.experimental.pallas import tpu as pltpu

EPSILON = 1e-07
_LANES = 128


def _choose_fold(batch, num_features):
    """Smallest power-of-two R dividing num_features s.t. batch*R % 8 == 0."""
    fold = 8 // math.gcd(batch, 8)
    while fold > 1 and num_features % fold != 0:
        fold //= 2
    return fold


def _choose_tile(br, nr, itemsize, tile_cols=None):
    """Feature-tile width (columns of the (br, nr) view) and grid length."""
    if tile_cols is not None:
        tile_n = int(tile_cols)
    else:
        # ~1 MiB per input per grid step; step overhead (~0.35us) amortized.
        target_bytes = 1 << 20
        cap = max(_LANES,
                  (target_bytes // max(1, br * itemsize)) // _LANES * _LANES)
        tile_n = nr if nr <= cap else cap
    if tile_n >= nr:
        # Single grid step; block == full array dims is always a legal shape.
        return nr, 1
    # Multi-step: last two block dims must be (8,128)-divisible -> lane align.
    tile_n = max(_LANES, (tile_n // _LANES) * _LANES)
    return tile_n, pl.cdiv(nr, tile_n)


def _make_stats_kernel(br, tile_n, nr, needs_mask):
    n_full = tile_n // _LANES
    rem = tile_n % _LANES

    def kernel(pred_ref, target_ref, acc_ref):
        j = pl.program_id(0)

        @pl.when(j == 0)
        def _():
            acc_ref[...] = jnp.zeros_like(acc_ref)

        zeros = jnp.zeros((br, _LANES), jnp.float32)
        lane_ids = jax.lax.broadcasted_iota(jnp.int32, (br, _LANES), 1)
        col0 = j * tile_n  # first (reshaped) feature column of this tile

        def chunk_update(k, carry):
            sp, sp2, st, st2 = carry
            start = pl.multiple_of(k * _LANES, _LANES)
            # Per-chunk ref loads keep vreg pressure low; cast to f32 here.
            pk = pred_ref[:, pl.ds(start, _LANES)].astype(jnp.float32)
            tk = target_ref[:, pl.ds(start, _LANES)].astype(jnp.float32)
            if needs_mask:
                # Edge block overhangs the array; mask garbage columns.
                valid = (col0 + start + lane_ids) < nr
                pk = jnp.where(valid, pk, 0.0)
                tk = jnp.where(valid, tk, 0.0)
            return (sp + pk, sp2 + pk * pk, st + tk, st2 + tk * tk)

        carry = (zeros, zeros, zeros, zeros)
        if n_full > 0:
            carry = jax.lax.fori_loop(0, n_full, chunk_update, carry,
                                      unroll=min(8, n_full))
        sp, sp2, st, st2 = carry

        if rem:  # only in the single-step (block == full dim) case
            pk = pred_ref[:, n_full * _LANES:tile_n].astype(jnp.float32)
            tk = target_ref[:, n_full * _LANES:tile_n].astype(jnp.float32)
            pad = jnp.zeros((br, _LANES - rem), jnp.float32)
            pk = jnp.concatenate([pk, pad], axis=1)
            tk = jnp.concatenate([tk, pad], axis=1)
            sp, sp2 = sp + pk, sp2 + pk * pk
            st, st2 = st + tk, st2 + tk * tk

        # One lane-dense 512-wide accumulate/store instead of four narrow ones.
        acc_ref[...] += jnp.concatenate([sp, sp2, st, st2], axis=1)

    return kernel


def correlation_coefficient_loss(pred_input, target_input, *, tile_cols=None):
    """pred_input, target_input: (B, C, H, W). Returns scalar f32 loss."""
    if pred_input.shape != target_input.shape:
        raise ValueError("pred/target shapes must match")
    batch = int(pred_input.shape[0])
    num_features = 1
    for d in pred_input.shape[1:]:
        num_features *= int(d)

    fold = _choose_fold(batch, num_features)
    br = batch * fold
    nr = num_features // fold

    # Free reshapes (contiguous row-major reinterpretation, no HBM copy).
    pred_r = pred_input.reshape(br, nr)
    target_r = target_input.reshape(br, nr)

    itemsize = jnp.dtype(pred_input.dtype).itemsize
    tile_n, num_tiles = _choose_tile(br, nr, itemsize, tile_cols)
    needs_mask = (nr % tile_n) != 0

    kernel = _make_stats_kernel(br, tile_n, nr, needs_mask)

    flops = int(6 * batch * num_features)
    bytes_accessed = int(2 * batch * num_features * itemsize
                         + br * 4 * _LANES * 4)

    acc = pl.pallas_call(
        kernel,
        grid=(num_tiles,),
        in_specs=[
            pl.BlockSpec((br, tile_n), lambda j: (0, j)),
            pl.BlockSpec((br, tile_n), lambda j: (0, j)),
        ],
        out_shape=jax.ShapeDtypeStruct((br, 4 * _LANES), jnp.float32),
        out_specs=pl.BlockSpec((br, 4 * _LANES), lambda j: (0, 0)),
        compiler_params=pltpu.CompilerParams(
            dimension_semantics=("arbitrary",),
            vmem_limit_bytes=32 * 1024 * 1024,
        ),
        cost_estimate=pl.CostEstimate(
            flops=flops, transcendentals=0, bytes_accessed=bytes_accessed),
    )(pred_r, target_r)

    # Scalar epilogue in plain JAX: fold sublane-groups + lanes, then the
    # similarity-index formula (matches PyTorch: ddof=1, N/(N-1), EPSILON).
    stats = jnp.sum(acc.reshape(batch, fold, 4, _LANES), axis=(1, 3))
    sum_p, sum_p2 = stats[:, 0], stats[:, 1]
    sum_t, sum_t2 = stats[:, 2], stats[:, 3]

    n = jnp.float32(num_features)
    dof = jnp.float32(num_features - 1 if num_features > 1 else 1)
    corr = jnp.float32(
        num_features / (num_features - 1) if num_features > 1 else 1.0)

    p_mean = sum_p / n
    t_mean = sum_t / n
    p_var = jnp.maximum(sum_p2 - sum_p * p_mean, 0.0) / dof
    t_var = jnp.maximum(sum_t2 - sum_t * t_mean, 0.0) / dof

    std_prod = jnp.sqrt(p_var * t_var)  # = p_std * t_std
    numerator = 2.0 * std_prod * p_mean * t_mean
    denominator = p_var * (t_mean * t_mean) + t_var * (p_mean * p_mean)
    sim = jnp.abs((numerator + EPSILON) / (denominator + EPSILON) * corr)
    return -jnp.mean(sim)


def _reference_loss(pred_input, target_input):
    # Pure-JAX reference mirroring the PyTorch forward exactly (two-pass).
    B = pred_input.shape[0]
    N = 1
    for d in pred_input.shape[1:]:
        N *= int(d)
    p = pred_input.reshape(B, -1).astype(jnp.float32)
    t = target_input.reshape(B, -1).astype(jnp.float32)
    p_mean = jnp.mean(p, axis=1, keepdims=True)
    t_mean = jnp.mean(t, axis=1, keepdims=True)
    p_std = jnp.std(p, axis=1, keepdims=True, ddof=1)
    t_std = jnp.std(t, axis=1, keepdims=True, ddof=1)
    num = 2 * p_std * t_std * p_mean * t_mean
    den = p_std ** 2 * t_mean ** 2 + t_std ** 2 * p_mean ** 2
    cf = N / (N - 1) if N > 1 else 1.0
    sim = jnp.abs((num + EPSILON) / (den + EPSILON) * cf)
    return -jnp.mean(sim)


if __name__ == "__main__":
    key = jax.random.PRNGKey(0)

    # Primary small shape (2, 4, 16, 16); extra cases exercise the
    # multi-tile reduction, the masked ragged edge block, the sub-128
    # remainder chunk, batch folding with B=3, and bf16 inputs.
    cases = [
        ((2, 4, 16, 16), None, jnp.float32),   # N=1024 -> single step
        ((2, 4, 32, 32), None, jnp.float32),   # N=4096 -> single step
        ((2, 8, 32, 32), 256, jnp.float32),    # forced multi-tile, aligned
        ((2, 3, 20, 20), None, jnp.float32),   # NR=300 -> remainder chunk
        ((2, 3, 20, 20), 128, jnp.float32),    # multi-tile + masked edge block
        ((2, 3, 5, 5), None, jnp.float32),     # tiny odd N, fold fallback
        ((3, 4, 16, 16), None, jnp.float32),   # B=3 -> fold=8, BR=24
        ((2, 4, 16, 16), None, jnp.bfloat16),  # bf16 inputs, cast in-kernel
    ]
    for i, (shp, tile_cols, dtype) in enumerate(cases):
        k1, k2 = jax.random.split(jax.random.fold_in(key, i))
        pred = (jax.random.normal(k1, shp, dtype=jnp.float32) + 0.5).astype(dtype)
        target = (jax.random.normal(k2, shp, dtype=jnp.float32) + 0.5).astype(dtype)

        loss = correlation_coefficient_loss(pred, target, tile_cols=tile_cols)
        jax.block_until_ready(loss)

        ref = _reference_loss(pred, target)
        assert jnp.allclose(loss, ref, rtol=1e-3, atol=1e-6), (
            shp, tile_cols, dtype, loss, ref)

    print("KERNEL_OK")
</pallas_src>

<mosaic_0001>
module attributes {stable_mosaic.version = 11 : i64} {
  func.func @kernel(%arg0: i32, %arg1: memref<8x256xf32, #tpu.memory_space<vmem>>, %arg2: memref<8x256xf32, #tpu.memory_space<vmem>>, %arg3: memref<8x512xf32, #tpu.memory_space<vmem>>) attributes {dimension_semantics = [#tpu.dimension_semantics<arbitrary>], iteration_bounds = array<i64: 1>, scalar_prefetch = 0 : i64, scratch_operands = 0 : i64, tpu.core_type = #tpu.core_type<tc>, window_params = [{transform_indices = @transform_0, window_bounds = array<i64: 8, 256>}, {transform_indices = @transform_1, window_bounds = array<i64: 8, 256>}, {pipeline_mode = #tpu.pipeline_mode<synchronous>, transform_indices = @transform_2, window_bounds = array<i64: 8, 512>}]} {
    %c0_i32 = arith.constant 0 : i32
    %0 = arith.cmpi eq, %arg0, %c0_i32 : i32
    %1 = arith.extui %0 : i1 to i32
    %c0_i32_0 = arith.constant 0 : i32
    %2 = arith.cmpi ne, %1, %c0_i32_0 : i32
    scf.if %2 {
      %cst_10 = arith.constant 0.000000e+00 : f32
      %32 = vector.broadcast %cst_10 : f32 to vector<8x512xf32>
      %c0_11 = arith.constant 0 : index
      %c0_12 = arith.constant 0 : index
      %33 = vector.load %arg3[%c0_11, %c0_12] : memref<8x512xf32, #tpu.memory_space<vmem>>, vector<8x512xf32>
      tpu.vector_store %arg3[%c0_11, %c0_12], %32 {strides = array<i32>} : memref<8x512xf32, #tpu.memory_space<vmem>>, vector<8x512xf32>,
    } else {
    }
    %cst = arith.constant 0.000000e+00 : f32
    %3 = vector.broadcast %cst : f32 to vector<8x128xf32>
    %c0_i32_1 = arith.constant 0 : i32
    %c128_i32 = arith.constant 128 : i32
    %4 = arith.muli %c0_i32_1, %c128_i32 : i32
    %5 = tpu.assume_multiple %4, 128 : i32
    %c0 = arith.constant 0 : index
    %6 = arith.index_cast %5 : i32 to index
    %7 = vector.load %arg1[%c0, %6] : memref<8x256xf32, #tpu.memory_space<vmem>>, vector<8x128xf32>
    %c0_2 = arith.constant 0 : index
    %8 = arith.index_cast %5 : i32 to index
    %9 = vector.load %arg2[%c0_2, %8] : memref<8x256xf32, #tpu.memory_space<vmem>>, vector<8x128xf32>
    %10 = arith.addf %3, %7 : vector<8x128xf32>
    %11 = arith.mulf %7, %7 : vector<8x128xf32>
    %12 = arith.addf %3, %11 : vector<8x128xf32>
    %13 = arith.addf %3, %9 : vector<8x128xf32>
    %14 = arith.mulf %9, %9 : vector<8x128xf32>
    %15 = arith.addf %3, %14 : vector<8x128xf32>
    %c1_i32 = arith.constant 1 : i32
    %c128_i32_3 = arith.constant 128 : i32
    %16 = arith.muli %c1_i32, %c128_i32_3 : i32
    %17 = tpu.assume_multiple %16, 128 : i32
    %c0_4 = arith.constant 0 : index
    %18 = arith.index_cast %17 : i32 to index
    %19 = vector.load %arg1[%c0_4, %18] : memref<8x256xf32, #tpu.memory_space<vmem>>, vector<8x128xf32>
    %c0_5 = arith.constant 0 : index
    %20 = arith.index_cast %17 : i32 to index
    %21 = vector.load %arg2[%c0_5, %20] : memref<8x256xf32, #tpu.memory_space<vmem>>, vector<8x128xf32>
    %22 = arith.addf %10, %19 : vector<8x128xf32>
    %23 = arith.mulf %19, %19 : vector<8x128xf32>
    %24 = arith.addf %12, %23 : vector<8x128xf32>
    %25 = arith.addf %13, %21 : vector<8x128xf32>
    %26 = arith.mulf %21, %21 : vector<8x128xf32>
    %27 = arith.addf %15, %26 : vector<8x128xf32>
    %c2_i32 = arith.constant 2 : i32
    %c0_6 = arith.constant 0 : index
    %c0_7 = arith.constant 0 : index
    %28 = vector.load %arg3[%c0_6, %c0_7] : memref<8x512xf32, #tpu.memory_space<vmem>>, vector<8x512xf32>
    %29 = tpu.concatenate %22, %24, %25, %27 in 1 : vector<8x128xf32>, vector<8x128xf32>, vector<8x128xf32>, vector<8x128xf32> -> vector<8x512xf32>
    %30 = arith.addf %28, %29 : vector<8x512xf32>
    %c0_8 = arith.constant 0 : index
    %c0_9 = arith.constant 0 : index
    %31 = vector.load %arg3[%c0_8, %c0_9] : memref<8x512xf32, #tpu.memory_space<vmem>>, vector<8x512xf32>
    tpu.vector_store %arg3[%c0_8, %c0_9], %30 {strides = array<i32>} : memref<8x512xf32, #tpu.memory_space<vmem>>, vector<8x512xf32>,
    return
  }
  func.func @transform_0(%arg0: i32) -> (i32, i32) {
    %c0_i32 = arith.constant 0 : i32
    %c0_i32_0 = arith.constant 0 : i32
    return %c0_i32, %arg0 : i32, i32
  }
  func.func @transform_1(%arg0: i32) -> (i32, i32) {
    %c0_i32 = arith.constant 0 : i32
    %c0_i32_0 = arith.constant 0 : i32
    return %c0_i32, %arg0 : i32, i32
  }
  func.func @transform_2(%arg0: i32) -> (i32, i32) {
    %c0_i32 = arith.constant 0 : i32
    %c0_i32_0 = arith.constant 0 : i32
    %c0_i32_1 = arith.constant 0 : i32
    return %c0_i32, %c0_i32_0 : i32, i32
  }
}

</mosaic_0001>

<bundles_post_ra>
// kernel: tpu_custom_call.1
= control target key start
LH: loop header
LB: loop body
LE: loop exit
PB: predicated region body
PF: predicated region fallthrough
CT: control target
= control target key end

     0   :  { %7 = vsyncpa [#allocation3], 0  ;;  %s220_s0 = inlined_call_operand.hbm [shape: f32[8,256], index: 0, kind: input, shape index: {}]   ;;  %s221_s1 = inlined_call_operand.hbm [shape: f32[8,256], index: 1, kind: input, shape index: {}]   ;;  %s222_s2 = inlined_call_operand.hbm [shape: f32[8,512], index: 2, kind: output, shape index: {}]  }
   0x1   :  { %8 = vsyncpa [#allocation6], 0 }
   0x2   :  { %9 = vsyncpa [#allocation4], 0  ;;  %s166_s9 = smov [#allocation2]   ;;  %s167_s11 = smov [#allocation5]  }
   0x3   :  { %s16_s10 = sshll.u32 %s166_s9, 4  ;;  %s26_s12 = sshll.u32 %s167_s11, 4  ;;  %s17_s10 = int_to_ptr.vmem [resolvable:$true] %s16_s10  ;;  %s27_s12 = int_to_ptr.vmem [resolvable:$true] %s26_s12 }
   0x4   :  { %s94_s15 = scalar_lea.hbm %s220_s0, 256 }
   0x5   :  { %p95_p0 = scmp.ne.s32.totalorder %s220_s0, %s94_s15  ;;  %p98_p1 = scmp.lt.u32.totalorder %s94_s15, %s220_s0 }
   0x7   :  { %p100_p2 = pnand %p98_p1, %p95_p0 }
   0x9   :  { %103 = shalt.err (!%p100_p2)
}
   0xa   :  { %s104_s20 = scalar_lea.vmem %s17_s10, 256  ;;  %p109_p4 = scmp.lt.s32.totalorder %s17_s10, %s17_s10 }
   0xb   :  { %p105_p3 = scmp.ne.s32.totalorder %s17_s10, %s104_s20  ;;  %p110_p5 = scmp.lt.s32.totalorder %s104_s20, %s104_s20 }
   0xd   :  { %p111_p6 = por %p110_p5, %p109_p4 }
   0xf   :  { %p112_p7 = pnand %p111_p6, %p105_p3 }
  0x11   :  { %115 = shalt.err (!%p112_p7)
}
  0x12   :  { %19 = dma.hbm_to_vmem [thread:$0]  %s220_s0, 256, %s17_s10, [#allocation3]  }
  0x13   :  { %s116_s25 = scalar_lea.hbm %s221_s1, 256 }
  0x14   :  { %p117_p8 = scmp.ne.s32.totalorder %s221_s1, %s116_s25  ;;  %p120_p9 = scmp.lt.u32.totalorder %s116_s25, %s221_s1 }
  0x16   :  { %p122_p10 = pnand %p120_p9, %p117_p8 }
  0x18   :  { %125 = shalt.err (!%p122_p10)
}
  0x19   :  { %s126_s30 = scalar_lea.vmem %s27_s12, 256  ;;  %p131_p12 = scmp.lt.s32.totalorder %s27_s12, %s27_s12 }
  0x1a   :  { %p127_p11 = scmp.ne.s32.totalorder %s27_s12, %s126_s30  ;;  %p132_p13 = scmp.lt.s32.totalorder %s126_s30, %s126_s30 }
  0x1c   :  { %p133_p0 = por %p132_p13, %p131_p12 }
  0x1e   :  { %p134_p1 = pnand %p133_p0, %p127_p11 }
  0x20   :  { %137 = shalt.err (!%p134_p1)
}
  0x21   :  { %29 = dma.hbm_to_vmem [thread:$0]  %s221_s1, 256, %s27_s12, [#allocation6]  }
  0x22   :  { %160 = dma.done.wait [#allocation3], 256  }
  0x23   :  { %161 = vsyncadd [#allocation3], 4294967040 }
  0x24   :  { %162 = dma.done.wait [#allocation6], 256  }
  0x25   :  { %163 = vsyncadd [#allocation6], 4294967040  ;;  %v44_v0 = vld [vmem:[#allocation2] sm:$0xff]  ;;  %v53_v1 = vld [vmem:[#allocation2 + $0x8] sm:$0xff]  ;;  %s168_s4 = smov [#allocation7]  }
  0x26   :  { %v45_v2 = vld [vmem:[#allocation5] sm:$0xff]  ;;  %v56_v3 = vadd.f32 %v53_v1, %v44_v0  ;;  %v47_v4 = vmul.f32 %v44_v0, %v44_v0  ;;  %v57_v5 = vmul.f32 %v53_v1, %v53_v1  ;;  %v55_v6 = vld [vmem:[#allocation5 + $0x8] sm:$0xff]  ;;  %s80_s5 = sshll.u32 %s168_s4, 4  ;;  %s81_s5 = int_to_ptr.vmem [resolvable:$true] %s80_s5 }
  0x27   :  { %v50_v7 = vmul.f32 %v45_v2, %v45_v2  ;;  %v59_v8 = vadd.f32 %v55_v6, %v45_v2  ;;  %v60_v9 = vmul.f32 %v55_v6, %v55_v6  ;;  %s138_s1 = scalar_lea.vmem %s81_s5, 512  ;;  %p143_p3 = scmp.lt.s32.totalorder %s81_s5, %s81_s5 }
  0x28   :  { %v58_v10 = vadd.f32 %v57_v5, %v47_v4  ;;  %70 = vst [vmem:[#allocation7] sm:$0xff] %v56_v3  ;;  %p139_p2 = scmp.ne.s32.totalorder %s81_s5, %s138_s1  ;;  %p144_p4 = scmp.lt.s32.totalorder %s138_s1, %s138_s1 }
  0x29   :  { %v61_v11 = vadd.f32 %v60_v9, %v50_v7  ;;  %72 = vst [vmem:[#allocation7 + $0x10] sm:$0xff] %v59_v8 }
  0x2a   :  { %71 = vst [vmem:[#allocation7 + $0x8] sm:$0xff] %v58_v10  ;;  %p145_p5 = por %p144_p4, %p143_p3 }
  0x2b   :  { %73 = vst [vmem:[#allocation7 + $0x18] sm:$0xff] %v61_v11 }
  0x2c   :  { %p146_p6 = pnand %p145_p5, %p139_p2 }
  0x2e   :  { %149 = shalt.err (!%p146_p6)
}
  0x2f   :  { %s150_s8 = scalar_lea.hbm %s222_s2, 512 }
  0x30   :  { %p151_p7 = scmp.ne.s32.totalorder %s222_s2, %s150_s8  ;;  %p154_p8 = scmp.lt.u32.totalorder %s150_s8, %s222_s2 }
  0x32   :  { %p156_p9 = pnand %p154_p8, %p151_p7 }
  0x34   :  { %159 = shalt.err (!%p156_p9)
}
  0x35   :  { %83 = dma.vmem_to_hbm [thread:$0]  %s81_s5, 512, %s222_s2, [#allocation4]  }
  0x36   :  { %164 = dma.done.wait [#allocation4], 512  }
  0x37   :  { %165 = vsyncadd [#allocation4], 4294966784 }
  0x38   :  { %87 = vsyncpa [#allocation3], 1 }
  0x39   :  { %88 = vsyncpa [#allocation6], 1 }
  0x3a   :  { %89 = vsyncpa [#allocation4], 1 }

</bundles_post_ra>
